<compile_context>
chip_gen: v6e
topology: v6e:2x2x1
jax: 0.10.0
libtpu: 0.0.40
codegen_flags: <defaults>
</compile_context>

<pallas_src>
import functools
import math

import jax
import jax.numpy as jnp
from jax import lax
from jax.experimental import pallas as pl
from jax.experimental.pallas import tpu as pltpu

_LANE = 128
# 4096x128 f32 = 2 MiB per block; 2 inputs x 2 pipeline buffers = 8 MiB VMEM,
# well under the explicit 32 MiB scoped-VMEM budget below (and v7x's 64 MiB
# physical VMEM).
_MAX_BLOCK_ROWS = 4096


def _split_aligned(x):
    """Flatten row-major; return (aligned (rows,128) prefix | None, tail, n)."""
    xf = jnp.reshape(x, (-1,))
    n = xf.shape[0]
    rows = n // _LANE
    main = xf[: rows * _LANE].reshape(rows, _LANE) if rows > 0 else None
    tail = xf[rows * _LANE:]
    return main, tail, n


def _make_kernel(bx, by, gx, gy, grid, last_rows_x, last_rows_y):
    need_tail_x = last_rows_x != bx      # final x block is partial
    need_tail_y = last_rows_y != by      # final y block is partial
    skip_x = gx != grid                  # grid steps >= gx carry no x work
    skip_y = gy != grid                  # grid steps >= gy carry no y work

    def _fold_into(acc_ref, l, brows):
        # Fold a (brows, 128) tile down into the (8, 128) vreg-tile accumulator.
        if brows % 8 == 0:
            acc_ref[...] += jnp.sum(l.reshape(brows // 8, 8, _LANE), axis=0)
        else:  # tiny full-array block (brows not a multiple of 8)
            acc_ref[0:1, :] += jnp.sum(l, axis=0, keepdims=True)

    def kernel(x_ref, y_ref, o_ref, acc_x_ref, acc_y_ref):
        i = pl.program_id(0)

        @pl.when(i == 0)
        def _():
            acc_x_ref[...] = jnp.zeros_like(acc_x_ref)
            acc_y_ref[...] = jnp.zeros_like(acc_y_ref)

        def do_x(valid_rows):
            v = x_ref[...].astype(jnp.float32)
            if valid_rows is not None:
                rid = lax.broadcasted_iota(jnp.int32, (bx, _LANE), 0)
                # invalid rows -> 1.0 so log(1.0) == 0 (where BEFORE log)
                v = jnp.where(rid < valid_rows, v, jnp.float32(1.0))
            _fold_into(acc_x_ref, jnp.log(v), bx)

        def do_y(valid_rows):
            v = y_ref[...].astype(jnp.float32)
            if valid_rows is not None:
                rid = lax.broadcasted_iota(jnp.int32, (by, _LANE), 0)
                # invalid rows -> 0.0 so log(1 - 0) == 0 (where BEFORE log)
                v = jnp.where(rid < valid_rows, v, jnp.float32(0.0))
            _fold_into(acc_y_ref, jnp.log(1.0 - v), by)

        # --- x: mask only the true final block; skip clamped steps entirely.
        if need_tail_x or skip_x:
            @pl.when(i < gx - 1)
            def _():
                do_x(None)

            @pl.when(i == gx - 1)
            def _():
                do_x(last_rows_x if need_tail_x else None)
        else:
            do_x(None)

        # --- y ---
        if need_tail_y or skip_y:
            @pl.when(i < gy - 1)
            def _():
                do_y(None)

            @pl.when(i == gy - 1)
            def _():
                do_y(last_rows_y if need_tail_y else None)
        else:
            do_y(None)

        @pl.when(i == grid - 1)
        def _():
            o_ref[0, 0] = jnp.sum(acc_x_ref[...])
            o_ref[0, 1] = jnp.sum(acc_y_ref[...])

    return kernel


def _in_spec(brows, nblocks, grid):
    if nblocks == grid:
        index_map = lambda i: (i, 0)
    elif nblocks == 1:
        index_map = lambda i: (0, 0)
    else:  # shorter input: clamp so clamped steps reuse the resident block
        index_map = lambda i: (jnp.minimum(i, nblocks - 1), 0)
    return pl.BlockSpec((brows, _LANE), index_map)


@functools.partial(jax.jit, static_argnames=("max_block_rows",))
def jsd_loss(d_x, d_y, max_block_rows=_MAX_BLOCK_ROWS):
    """JSDLoss.forward: -(log 2 + 0.5*(mean(log d_x) + mean(log(1 - d_y))))."""
    xm, x_tail, nx = _split_aligned(d_x)
    ym, y_tail, ny = _split_aligned(d_y)

    # Inputs with fewer than 128 elements go entirely through the XLA tail
    # path; feed the kernel a neutral dummy block (contributes exactly 0).
    if xm is None:
        xm = jnp.ones((8, _LANE), jnp.float32)       # log(1) == 0
    if ym is None:
        ym = jnp.zeros((8, _LANE), jnp.float32)      # log(1 - 0) == 0

    rx, ry = xm.shape[0], ym.shape[0]
    bx = rx if rx <= max_block_rows else max_block_rows
    by = ry if ry <= max_block_rows else max_block_rows
    gx = pl.cdiv(rx, bx)
    gy = pl.cdiv(ry, by)
    grid = max(gx, gy)
    last_rows_x = rx - (gx - 1) * bx
    last_rows_y = ry - (gy - 1) * by

    kernel = _make_kernel(bx, by, gx, gy, grid, last_rows_x, last_rows_y)

    sums = pl.pallas_call(
        kernel,
        out_shape=jax.ShapeDtypeStruct((1, 2), jnp.float32),
        grid=(grid,),
        in_specs=[_in_spec(bx, gx, grid), _in_spec(by, gy, grid)],
        out_specs=pl.BlockSpec((1, 2), lambda i: (0, 0),
                               memory_space=pltpu.SMEM),
        scratch_shapes=[
            pltpu.VMEM((8, _LANE), jnp.float32),   # x accumulator: one vreg tile
            pltpu.VMEM((8, _LANE), jnp.float32),   # y accumulator: one vreg tile
        ],
        compiler_params=pltpu.CompilerParams(
            dimension_semantics=("arbitrary",),
            vmem_limit_bytes=32 * 1024 * 1024),
    )(xm, ym)

    sum_x = sums[0, 0]
    sum_y = sums[0, 1]
    # <128-element remainders handled with plain XLA (negligible work).
    if x_tail.shape[0]:
        sum_x = sum_x + jnp.sum(jnp.log(x_tail.astype(jnp.float32)))
    if y_tail.shape[0]:
        sum_y = sum_y + jnp.sum(jnp.log(1.0 - y_tail.astype(jnp.float32)))

    return -(jnp.float32(math.log(2.0))
             + 0.5 * (sum_x / jnp.float32(nx) + sum_y / jnp.float32(ny)))


def _ref_loss(d_x, d_y):
    d_x = d_x.astype(jnp.float32)
    d_y = d_y.astype(jnp.float32)
    return -(math.log(2.0) + 0.5 * (jnp.mean(jnp.log(d_x))
                                    + jnp.mean(jnp.log(1.0 - d_y))))


def _check(loss, ref, tag):
    loss = jax.block_until_ready(loss)
    assert jnp.allclose(loss, ref, rtol=1e-4, atol=1e-4), (tag, loss, ref)


if __name__ == "__main__":
    key = jax.random.PRNGKey(0)
    kx, ky, ka, kb, kc, kd = jax.random.split(key, 6)

    # 1) Primary example: discriminator outputs in (0,1), batch=2, ch=4, 16x16.
    d_x = jax.nn.sigmoid(jax.random.normal(kx, (2, 4, 16, 16), jnp.float32))
    d_y = jax.nn.sigmoid(jax.random.normal(ky, (2, 4, 16, 16), jnp.float32))
    _check(jsd_loss(d_x, d_y), _ref_loss(d_x, d_y), "f32")

    # 2) bf16 inputs (half the HBM traffic); in-kernel upcast + f32 accumulation.
    _check(jsd_loss(d_x.astype(jnp.bfloat16), d_y.astype(jnp.bfloat16)),
           _ref_loss(d_x.astype(jnp.bfloat16), d_y.astype(jnp.bfloat16)), "bf16")

    # 3) Mismatched sizes: tiny (<128) x handled via the XLA tail + neutral
    #    dummy block; large aligned y streamed through the kernel.
    d_x3 = jax.nn.sigmoid(jax.random.normal(ka, (3, 5, 7), jnp.float32))
    d_y3 = jax.nn.sigmoid(jax.random.normal(kb, (2, 8, 128, 128), jnp.float32))
    _check(jsd_loss(d_x3, d_y3), _ref_loss(d_x3, d_y3), "mismatched")

    # 4) Small max_block_rows override to exercise multi-step accumulation,
    #    clamped/skipped steps, the partial-final-block row mask and the
    #    non-multiple-of-8 fold path, all at small shapes.
    d_x4 = jax.nn.sigmoid(jax.random.normal(kc, (20, 13), jnp.float32))
    d_y4 = jax.nn.sigmoid(jax.random.normal(kd, (2, 3, 100, 128), jnp.float32))
    _check(jsd_loss(d_x4, d_y4, max_block_rows=256),
           _ref_loss(d_x4, d_y4), "multi-step")

    print("KERNEL_OK")
</pallas_src>

<mosaic_0001>
module attributes {stable_mosaic.version = 11 : i64} {
  func.func @kernel(%arg0: i32, %arg1: memref<16x128xf32, #tpu.memory_space<vmem>>, %arg2: memref<16x128xf32, #tpu.memory_space<vmem>>, %arg3: memref<1x2xf32, #tpu.memory_space<smem>>, %arg4: memref<8x128xf32, #tpu.memory_space<vmem>>, %arg5: memref<8x128xf32, #tpu.memory_space<vmem>>) attributes {dimension_semantics = [#tpu.dimension_semantics<arbitrary>], iteration_bounds = array<i64: 1>, scalar_prefetch = 0 : i64, scratch_operands = 2 : i64, tpu.core_type = #tpu.core_type<tc>, window_params = [{transform_indices = @transform_0, window_bounds = array<i64: 16, 128>}, {transform_indices = @transform_1, window_bounds = array<i64: 16, 128>}, {transform_indices = @transform_2, window_bounds = array<i64: 1, 2>}]} {
    %c0_i32 = arith.constant 0 : i32
    %0 = arith.cmpi eq, %arg0, %c0_i32 : i32
    %1 = arith.extui %0 : i1 to i32
    %c0_i32_0 = arith.constant 0 : i32
    %2 = arith.cmpi ne, %1, %c0_i32_0 : i32
    scf.if %2 {
      %cst_16 = arith.constant 0.000000e+00 : f32
      %22 = vector.broadcast %cst_16 : f32 to vector<8x128xf32>
      %c0_17 = arith.constant 0 : index
      %c0_18 = arith.constant 0 : index
      %23 = vector.load %arg4[%c0_17, %c0_18] : memref<8x128xf32, #tpu.memory_space<vmem>>, vector<8x128xf32>
      tpu.vector_store %arg4[%c0_17, %c0_18], %22 {strides = array<i32>} : memref<8x128xf32, #tpu.memory_space<vmem>>, vector<8x128xf32>,
      %cst_19 = arith.constant 0.000000e+00 : f32
      %24 = vector.broadcast %cst_19 : f32 to vector<8x128xf32>
      %c0_20 = arith.constant 0 : index
      %c0_21 = arith.constant 0 : index
      %25 = vector.load %arg5[%c0_20, %c0_21] : memref<8x128xf32, #tpu.memory_space<vmem>>, vector<8x128xf32>
      tpu.vector_store %arg5[%c0_20, %c0_21], %24 {strides = array<i32>} : memref<8x128xf32, #tpu.memory_space<vmem>>, vector<8x128xf32>,
    } else {
    }
    %c0 = arith.constant 0 : index
    %c0_1 = arith.constant 0 : index
    %3 = vector.load %arg1[%c0, %c0_1] : memref<16x128xf32, #tpu.memory_space<vmem>>, vector<16x128xf32>
    %4 = math.log %3 : vector<16x128xf32>
    %c0_2 = arith.constant 0 : index
    %c0_3 = arith.constant 0 : index
    %5 = vector.load %arg4[%c0_2, %c0_3] : memref<8x128xf32, #tpu.memory_space<vmem>>, vector<8x128xf32>
    %6 = vector.shape_cast %4 : vector<16x128xf32> to vector<2x8x128xf32>
    %cst = arith.constant dense<0.000000e+00> : vector<8x128xf32>
    %7 = vector.multi_reduction <add>, %6, %cst [0] : vector<2x8x128xf32> to vector<8x128xf32>
    %8 = arith.addf %5, %7 : vector<8x128xf32>
    %c0_4 = arith.constant 0 : index
    %c0_5 = arith.constant 0 : index
    %9 = vector.load %arg4[%c0_4, %c0_5] : memref<8x128xf32, #tpu.memory_space<vmem>>, vector<8x128xf32>
    tpu.vector_store %arg4[%c0_4, %c0_5], %8 {strides = array<i32>} : memref<8x128xf32, #tpu.memory_space<vmem>>, vector<8x128xf32>,
    %c0_6 = arith.constant 0 : index
    %c0_7 = arith.constant 0 : index
    %10 = vector.load %arg2[%c0_6, %c0_7] : memref<16x128xf32, #tpu.memory_space<vmem>>, vector<16x128xf32>
    %cst_8 = arith.constant 1.000000e+00 : f32
    %11 = vector.broadcast %cst_8 : f32 to vector<16x128xf32>
    %12 = arith.subf %11, %10 : vector<16x128xf32>
    %13 = math.log %12 : vector<16x128xf32>
    %c0_9 = arith.constant 0 : index
    %c0_10 = arith.constant 0 : index
    %14 = vector.load %arg5[%c0_9, %c0_10] : memref<8x128xf32, #tpu.memory_space<vmem>>, vector<8x128xf32>
    %15 = vector.shape_cast %13 : vector<16x128xf32> to vector<2x8x128xf32>
    %cst_11 = arith.constant dense<0.000000e+00> : vector<8x128xf32>
    %16 = vector.multi_reduction <add>, %15, %cst_11 [0] : vector<2x8x128xf32> to vector<8x128xf32>
    %17 = arith.addf %14, %16 : vector<8x128xf32>
    %c0_12 = arith.constant 0 : index
    %c0_13 = arith.constant 0 : index
    %18 = vector.load %arg5[%c0_12, %c0_13] : memref<8x128xf32, #tpu.memory_space<vmem>>, vector<8x128xf32>
    tpu.vector_store %arg5[%c0_12, %c0_13], %17 {strides = array<i32>} : memref<8x128xf32, #tpu.memory_space<vmem>>, vector<8x128xf32>,
    %c0_i32_14 = arith.constant 0 : i32
    %19 = arith.cmpi eq, %arg0, %c0_i32_14 : i32
    %20 = arith.extui %19 : i1 to i32
    %c0_i32_15 = arith.constant 0 : i32
    %21 = arith.cmpi ne, %20, %c0_i32_15 : i32
    scf.if %21 {
      %c0_16 = arith.constant 0 : index
      %c0_17 = arith.constant 0 : index
      %22 = vector.load %arg4[%c0_16, %c0_17] : memref<8x128xf32, #tpu.memory_space<vmem>>, vector<8x128xf32>
      %23 = vector.shape_cast %22 : vector<8x128xf32> to vector<1x8x128xf32>
      %cst_18 = arith.constant dense<0.000000e+00> : vector<1xf32>
      %24 = vector.multi_reduction <add>, %23, %cst_18 [1, 2] : vector<1x8x128xf32> to vector<1xf32>
      %25 = vector.shape_cast %24 : vector<1xf32> to vector<1x1x1xf32>
      %26 = vector.extract %25[0, 0, 0] : f32 from vector<1x1x1xf32>
      %c0_19 = arith.constant 0 : index
      %c0_20 = arith.constant 0 : index
      %27 = memref.load %arg3[%c0_19, %c0_20] : memref<1x2xf32, #tpu.memory_space<smem>>
      memref.store %26, %arg3[%c0_19, %c0_20] : memref<1x2xf32, #tpu.memory_space<smem>>
      %c0_21 = arith.constant 0 : index
      %c0_22 = arith.constant 0 : index
      %28 = vector.load %arg5[%c0_21, %c0_22] : memref<8x128xf32, #tpu.memory_space<vmem>>, vector<8x128xf32>
      %29 = vector.shape_cast %28 : vector<8x128xf32> to vector<1x8x128xf32>
      %cst_23 = arith.constant dense<0.000000e+00> : vector<1xf32>
      %30 = vector.multi_reduction <add>, %29, %cst_23 [1, 2] : vector<1x8x128xf32> to vector<1xf32>
      %31 = vector.shape_cast %30 : vector<1xf32> to vector<1x1x1xf32>
      %32 = vector.extract %31[0, 0, 0] : f32 from vector<1x1x1xf32>
      %c0_24 = arith.constant 0 : index
      %c1 = arith.constant 1 : index
      %33 = memref.load %arg3[%c0_24, %c1] : memref<1x2xf32, #tpu.memory_space<smem>>
      memref.store %32, %arg3[%c0_24, %c1] : memref<1x2xf32, #tpu.memory_space<smem>>
    } else {
    }
    return
  }
  func.func @transform_0(%arg0: i32) -> (i32, i32) {
    %c0_i32 = arith.constant 0 : i32
    %c0_i32_0 = arith.constant 0 : i32
    return %arg0, %c0_i32 : i32, i32
  }
  func.func @transform_1(%arg0: i32) -> (i32, i32) {
    %c0_i32 = arith.constant 0 : i32
    %c0_i32_0 = arith.constant 0 : i32
    return %arg0, %c0_i32 : i32, i32
  }
  func.func @transform_2(%arg0: i32) -> (i32, i32) {
    %c0_i32 = arith.constant 0 : i32
    %c0_i32_0 = arith.constant 0 : i32
    %c0_i32_1 = arith.constant 0 : i32
    return %c0_i32, %c0_i32_0 : i32, i32
  }
}

</mosaic_0001>

<bundles_post_ra>
// kernel: jsd_loss.1
= control target key start
LH: loop header
LB: loop body
LE: loop exit
PB: predicated region body
PF: predicated region fallthrough
CT: control target
= control target key end

     0   :  { %s140_s0 = inlined_call_operand.vmem [shape: f32[16,128], index: 0, kind: input, shape index: {}]   ;;  %s141_s1 = inlined_call_operand.vmem [shape: f32[16,128], index: 1, kind: input, shape index: {}]   ;;  %s142_s2 = inlined_call_operand.vmem [shape: f32[1,2], index: 2, kind: output, shape index: {}]  }
   0x1   :  { %v18_v0 = vld [vmem:[%s140_s0] sm:$0xff]  ;;  %v19_v1 = vld [vmem:[%s140_s0 + $0x8] sm:$0xff] }
   0x2   :  { %v28_v2 = vld [vmem:[%s141_s1] sm:$0xff]  ;;  %87 = vlog2.f32 %v18_v0  ;;  %v29_v3 = vld [vmem:[%s141_s1 + $0x8] sm:$0xff] }
   0x3   :  { %v30_v4 = vsub.f32 1.0, %v28_v2 }
   0x4   :  { %7 = vsyncpa [#allocation5], 0  ;;  %89 = vlog2.f32 %v19_v1  ;;  %v31_v5 = vsub.f32 1.0, %v29_v3  ;;  %s73_s18 = sshll.u32 %s142_s2, 4  ;;  %s74_s18 = int_to_ptr.vmem [resolvable:$true] %s73_s18 }
   0x5   :  { %91 = vlog2.f32 %v30_v4  ;;  %s95_s20 = scalar_lea.vmem %s74_s18, 16  ;;  %p100_p1 = scmp.lt.s32.totalorder %s74_s18, %s74_s18 }
   0x6   :  { %93 = vlog2.f32 %v31_v5  ;;  %p96_p0 = scmp.ne.s32.totalorder %s74_s18, %s95_s20  ;;  %p101_p2 = scmp.lt.s32.totalorder %s95_s20, %s95_s20 }
   0x8   :  { %p102_p3 = por %p101_p2, %p100_p1 }
   0xa   :  { %p103_p4 = pnand %p102_p3, %p96_p0 }
   0xf   :  { %v88_v6 = vpop.eup %87 }
  0x10   :  { %v21_v8 = vmul.f32 0.6931472, %v88_v6 }
  0x11   :  { %v90_v7 = vpop.eup %89 }
  0x12   :  { %v92_v9 = vpop.eup %91  ;;  %v23_v10 = vmul.f32 0.6931472, %v90_v7 }
  0x13   :  { %v94_v11 = vpop.eup %93  ;;  %v33_v12 = vmul.f32 0.6931472, %v92_v9 }
  0x14   :  { %v25_v13 = vadd.f32 %v23_v10, %v21_v8  ;;  %v35_v14 = vmul.f32 0.6931472, %v94_v11 }
  0x16   :  { %44 = vadd.xlane.f32.xlu0 %v25_v13  ;;  %v37_v15 = vadd.f32 %v35_v14, %v33_v12 }
  0x1a   :  { %56 = vadd.xlane.f32.xlu0 %v37_v15 }
  0x9f   :  { %v45_v16 = vpop.xlane.xlu0 %44 }
  0xa0   :  { %v46_v17 = vrot.slane %v45_v16, 4 }
  0xa2   :  { %v47_v18 = vadd.f32 %v46_v17, %v45_v16 }
  0xa3   :  { %v57_v19 = vpop.xlane.xlu0 %56 }
  0xa4   :  { %v48_v20 = vrot.slane %v47_v18, 2  ;;  %v58_v21 = vrot.slane %v57_v19, 4 }
  0xa6   :  { %v59_v22 = vadd.f32 %v58_v21, %v57_v19  ;;  %v49_v23 = vadd.f32 %v48_v20, %v47_v18 }
  0xa8   :  { %v60_v24 = vrot.slane %v59_v22, 2  ;;  %v50_v25 = vrot.slane %v49_v23, 1 }
  0xaa   :  { %v61_v26 = vadd.f32 %v60_v24, %v59_v22  ;;  %v51_v27 = vadd.f32 %v50_v25, %v49_v23 }
  0xac   :  { %82 = vpush %v51_v27  ;;  %v62_v28 = vrot.slane %v61_v26, 1 }
  0xae   :  { %v63_v29 = vadd.f32 %v62_v28, %v61_v26 }
  0xb0   :  { %84 = vpush %v63_v29 }
  0xdd   :  { %s83_s0 = spop %82 }
  0xde   :  { %54 = sst [smem:[#allocation4]] %s83_s0 }
  0xe1   :  { %s85_s19 = spop %84 }
  0xe2   :  { %66 = sst [smem:[#allocation4 + $0x1]] %s85_s19 }
  0xe3   :  { %106 = shalt.err (!%p103_p4)
}
  0xe4   :  { %s109_s21 = smov [#allocation4]  }
  0xe5   :  { %76 = dma.smem_to_vmem %s109_s21, 16, %s74_s18, [#allocation5]  }
  0xe6   :  { %107 = dma.done.wait [#allocation5], 16  }
  0xe7   :  { %108 = vsyncadd [#allocation5], 4294967280 }
  0xe8   :  { %80 = sfence }
  0xe9   :  { %81 = vsyncpa [#allocation5], 1 }

</bundles_post_ra>
